<compile_context>
chip_gen: v7x
topology: tpu7x:2x2x1
jax: 0.10.0
libtpu: 0.0.40
codegen_flags: <defaults>
</compile_context>

<pallas_src>
import jax
import jax.numpy as jnp
from jax.experimental import pallas as pl
from jax.experimental.pallas import tpu as pltpu

NEG_PAD = -1e30  # pad value for vocab-padding lanes (ignored by max/logsumexp)


def _round_up(x, m):
    return ((x + m - 1) // m) * m


def _make_gather_kernel(tile_n, vr, v_real):
    """Inference path: logits[i, :] = table[idx[i], :] via one-hot MXU gather."""

    def kernel(idx_ref, table_ref, logits_ref):
        tok = jnp.clip(idx_ref[...], 0, v_real - 1)                      # (TN, 1)
        row_ids = jax.lax.broadcasted_iota(jnp.int32, (tile_n, vr), 1)   # (TN, Vr)
        one_hot = (row_ids == tok).astype(jnp.float32)
        logits_ref[...] = jnp.dot(one_hot, table_ref[...],
                                  preferred_element_type=jnp.float32)

    return kernel


def _make_train_kernel(tile_n, vr, vp, v_real, n_valid, write_logits):
    """Training path: one-hot gather + fully vectorized per-row cross entropy."""

    def kernel(idx_ref, tgt_ref, table_ref, *out_refs):
        if write_logits:
            logits_ref, nll_ref = out_refs
        else:
            (nll_ref,) = out_refs
        t = pl.program_id(0)

        # One-hot gather of the embedding rows (MXU; vex slot otherwise idle).
        tok = jnp.clip(idx_ref[...], 0, v_real - 1)                      # (TN, 1)
        row_ids = jax.lax.broadcasted_iota(jnp.int32, (tile_n, vr), 1)   # (TN, Vr)
        one_hot = (row_ids == tok).astype(jnp.float32)
        logits = jnp.dot(one_hot, table_ref[...],
                         preferred_element_type=jnp.float32)             # (TN, Vp)
        if write_logits:
            logits_ref[...] = logits

        # Cross entropy vectorized over the whole tile (no per-row loop, no
        # scalar carry chain).  Padded lanes are NEG_PAD -> exp underflows to 0.
        m = jnp.max(logits, axis=-1, keepdims=True)                      # (TN, 1)
        lse = m + jnp.log(jnp.sum(jnp.exp(logits - m), axis=-1, keepdims=True))
        col = jax.lax.broadcasted_iota(jnp.int32, (tile_n, vp), 1)       # (TN, Vp)
        tgt = tgt_ref[...]                                               # (TN, 1)
        tgt_logit = jnp.sum(jnp.where(col == tgt, logits, 0.0),
                            axis=-1, keepdims=True)                      # (TN, 1)

        # Mask padded rows with a row-index compare (per-tile partial loss).
        row = t * tile_n + jax.lax.broadcasted_iota(jnp.int32, (tile_n, 1), 0)
        nll_ref[...] = jnp.where(row < n_valid, lse - tgt_logit,
                                 jnp.float32(0.0))

    return kernel


def bigram_forward(idx, table, targets=None, return_logits=True):
    """Mirrors BigramLanguageModel.forward.

    Returns (logits, loss):
      - targets is None:                logits (B, T, V),  loss None
      - targets given:                  logits (B*T, V),   loss scalar f32
      - targets given, return_logits=False:  (None, loss)  (skips logits HBM writeback)
    """
    B, T = idx.shape
    V = table.shape[0]
    N = B * T

    Vp = _round_up(V, 128)   # lane-dense padded vocab
    Vr = _round_up(V, 8)     # sublane-padded table rows

    # Large row tiles amortize per-grid-step overhead; clamp so a double-buffered
    # (TN, Vp) f32 logits block stays well under the VMEM scoped limit.
    # TODO(synk): very large vocabularies would also need tiling over the vocab axis.
    vmem_rows = max(8, ((8 * 1024 * 1024) // (Vp * 4 * 2)) // 8 * 8)
    TN = min(512, _round_up(N, 8), vmem_rows)
    Np = _round_up(N, TN)
    num_tiles = Np // TN

    # Pad the table once:
    #   columns V..Vp-1 -> NEG_PAD (never affect max / logsumexp)
    #   rows    V..Vr-1 -> 0       (never selected: ids clamped / one-hot weight 0)
    table_f = table.astype(jnp.float32)
    table_p = jnp.pad(table_f, ((0, 0), (0, Vp - V)), constant_values=NEG_PAD)
    table_p = jnp.pad(table_p, ((0, Vr - V), (0, 0)), constant_values=0.0)

    idx_p = jnp.pad(idx.reshape(-1).astype(jnp.int32), (0, Np - N)).reshape(Np, 1)

    idx_spec = pl.BlockSpec((TN, 1), lambda t: (t, 0))
    tab_spec = pl.BlockSpec((Vr, Vp), lambda t: (0, 0))       # table stays resident
    logits_spec = pl.BlockSpec((TN, Vp), lambda t: (t, 0))    # lane-dense output
    nll_spec = pl.BlockSpec((TN, 1), lambda t: (t, 0))

    if targets is None:
        logits_p = pl.pallas_call(
            _make_gather_kernel(TN, Vr, V),
            out_shape=jax.ShapeDtypeStruct((Np, Vp), jnp.float32),
            grid=(num_tiles,),
            in_specs=[idx_spec, tab_spec],
            out_specs=logits_spec,
            compiler_params=pltpu.CompilerParams(
                dimension_semantics=("parallel",)),
        )(idx_p, table_p)
        return logits_p[:N, :V].reshape(B, T, V), None

    tgt_p = jnp.pad(targets.reshape(-1).astype(jnp.int32),
                    (0, Np - N)).reshape(Np, 1)

    if return_logits:
        out_shape = (jax.ShapeDtypeStruct((Np, Vp), jnp.float32),
                     jax.ShapeDtypeStruct((Np, 1), jnp.float32))
        out_specs = (logits_spec, nll_spec)
    else:
        out_shape = jax.ShapeDtypeStruct((Np, 1), jnp.float32)
        out_specs = nll_spec

    outs = pl.pallas_call(
        _make_train_kernel(TN, Vr, Vp, V, N, return_logits),
        out_shape=out_shape,
        grid=(num_tiles,),
        in_specs=[idx_spec,
                  pl.BlockSpec((TN, 1), lambda t: (t, 0)),    # targets
                  tab_spec],
        out_specs=out_specs,
        compiler_params=pltpu.CompilerParams(
            dimension_semantics=("parallel",)),   # no cross-tile state -> megacore OK
    )(idx_p, tgt_p, table_p)

    if return_logits:
        logits_p, nll = outs
    else:
        logits_p, nll = None, outs

    loss = jnp.sum(nll) / jnp.float32(N)   # padded rows contribute exactly 0
    if return_logits:
        return logits_p[:N, :V], loss
    return None, loss


# TODO(synk): generate() (autoregressive torch.multinomial sampling loop) is
# host-side control flow and is not implemented as a kernel.


if __name__ == "__main__":
    vocab_size = 65   # char-level vocab size (e.g. tiny-Shakespeare charset)
    B, T = 2, 8

    key = jax.random.PRNGKey(0)
    k_tab, k_idx, k_tgt = jax.random.split(key, 3)

    # nn.Embedding default init ~ N(0, 1)
    table = jax.random.normal(k_tab, (vocab_size, vocab_size), dtype=jnp.float32)
    idx = jax.random.randint(k_idx, (B, T), 0, vocab_size, dtype=jnp.int32)
    targets = jax.random.randint(k_tgt, (B, T), 0, vocab_size, dtype=jnp.int32)

    def ref_forward(idx_, tgt_):
        lg = table[idx_.reshape(-1)]
        lse = jax.nn.logsumexp(lg, axis=-1)
        nll = lse - lg[jnp.arange(lg.shape[0]), tgt_.reshape(-1)]
        return lg, jnp.mean(nll)

    # Training path (with targets, logits materialized)
    logits, loss = bigram_forward(idx, table, targets)
    jax.block_until_ready((logits, loss))
    ref_logits, ref_loss = ref_forward(idx, targets)
    assert logits.shape == (B * T, vocab_size)
    assert jnp.allclose(logits, ref_logits, atol=1e-5), "logits mismatch"
    assert jnp.allclose(loss, ref_loss, atol=1e-5, rtol=1e-5), "loss mismatch"

    # Loss-only training path (skips the logits HBM writeback)
    _, loss_only = bigram_forward(idx, table, targets, return_logits=False)
    jax.block_until_ready(loss_only)
    assert jnp.allclose(loss_only, ref_loss, atol=1e-5, rtol=1e-5), "loss-only mismatch"

    # Inference path (no targets)
    logits_inf, loss_inf = bigram_forward(idx, table, None)
    jax.block_until_ready(logits_inf)
    assert logits_inf.shape == (B, T, vocab_size)
    assert loss_inf is None
    assert jnp.allclose(logits_inf.reshape(B * T, vocab_size), ref_logits, atol=1e-5)

    # Multi-tile case (exercises grid > 1 and the parallel partial-loss path)
    B2, T2 = 8, 128
    k_idx2, k_tgt2 = jax.random.split(jax.random.PRNGKey(1), 2)
    idx2 = jax.random.randint(k_idx2, (B2, T2), 0, vocab_size, dtype=jnp.int32)
    tgt2 = jax.random.randint(k_tgt2, (B2, T2), 0, vocab_size, dtype=jnp.int32)
    logits2, loss2 = bigram_forward(idx2, table, tgt2)
    jax.block_until_ready((logits2, loss2))
    ref_logits2, ref_loss2 = ref_forward(idx2, tgt2)
    assert jnp.allclose(logits2, ref_logits2, atol=1e-5), "multi-tile logits mismatch"
    assert jnp.allclose(loss2, ref_loss2, atol=1e-5, rtol=1e-5), "multi-tile loss mismatch"

    print("KERNEL_OK")
</pallas_src>

<mosaic_0001>
module attributes {stable_mosaic.version = 11 : i64} {
  func.func @kernel(%arg0: i32, %arg1: memref<16x1xi32, #tpu.memory_space<vmem>>, %arg2: memref<16x1xi32, #tpu.memory_space<vmem>>, %arg3: memref<72x128xf32, #tpu.memory_space<vmem>>, %arg4: memref<16x128xf32, #tpu.memory_space<vmem>>, %arg5: memref<16x1xf32, #tpu.memory_space<vmem>>) attributes {dimension_semantics = [#tpu.dimension_semantics<parallel>], iteration_bounds = array<i64: 1>, scalar_prefetch = 0 : i64, scratch_operands = 0 : i64, tpu.core_type = #tpu.core_type<tc>, window_params = [{transform_indices = @transform_0, window_bounds = array<i64: 16, 1>}, {transform_indices = @transform_1, window_bounds = array<i64: 16, 1>}, {pipeline_mode = #tpu.pipeline_mode<synchronous>, transform_indices = @transform_2, window_bounds = array<i64: 72, 128>}, {transform_indices = @transform_3, window_bounds = array<i64: 16, 128>}, {transform_indices = @transform_4, window_bounds = array<i64: 16, 1>}]} {
    %c0 = arith.constant 0 : index
    %c0_0 = arith.constant 0 : index
    %0 = vector.load %arg1[%c0, %c0_0] : memref<16x1xi32, #tpu.memory_space<vmem>>, vector<16x1xi32>
    %c0_i32 = arith.constant 0 : i32
    %c64_i32 = arith.constant 64 : i32
    %1 = vector.broadcast %c0_i32 : i32 to vector<16x1xi32>
    %2 = arith.maxsi %1, %0 : vector<16x1xi32>
    %3 = vector.broadcast %c64_i32 : i32 to vector<16x1xi32>
    %4 = arith.minsi %3, %2 : vector<16x1xi32>
    %5 = tpu.iota {dimensions = array<i32: 1>} : vector<16x72xi32>
    %6 = vector.broadcast %4 : vector<16x1xi32> to vector<16x72xi32>
    %7 = arith.cmpi eq, %5, %6 : vector<16x72xi32>
    %8 = arith.extui %7 : vector<16x72xi1> to vector<16x72xi32>
    %9 = arith.sitofp %8 : vector<16x72xi32> to vector<16x72xf32>
    %c0_1 = arith.constant 0 : index
    %c0_2 = arith.constant 0 : index
    %10 = vector.load %arg3[%c0_1, %c0_2] : memref<72x128xf32, #tpu.memory_space<vmem>>, vector<72x128xf32>
    %cst = arith.constant dense<0.000000e+00> : vector<16x128xf32>
    %11 = tpu.matmul %9, %10, %cst {dimension_numbers = #tpu.dot_dimension_numbers<[1], [0], [0], [1], [0, 0, 1, 1], [], []>} : vector<16x72xf32>, vector<72x128xf32>, vector<16x128xf32> -> vector<16x128xf32>
    %c0_3 = arith.constant 0 : index
    %c0_4 = arith.constant 0 : index
    %12 = vector.load %arg4[%c0_3, %c0_4] : memref<16x128xf32, #tpu.memory_space<vmem>>, vector<16x128xf32>
    tpu.vector_store %arg4[%c0_3, %c0_4], %11 {strides = array<i32>} : memref<16x128xf32, #tpu.memory_space<vmem>>, vector<16x128xf32>,
    %cst_5 = arith.constant dense<0xFF800000> : vector<16xf32>
    %13 = vector.multi_reduction <maximumf>, %11, %cst_5 [1] : vector<16x128xf32> to vector<16xf32>
    %14 = vector.shape_cast %13 : vector<16xf32> to vector<16x1xf32>
    %15 = vector.broadcast %14 : vector<16x1xf32> to vector<16x128xf32>
    %16 = arith.subf %11, %15 : vector<16x128xf32>
    %17 = math.exp %16 : vector<16x128xf32>
    %cst_6 = arith.constant dense<0.000000e+00> : vector<16xf32>
    %18 = vector.multi_reduction <add>, %17, %cst_6 [1] : vector<16x128xf32> to vector<16xf32>
    %19 = vector.shape_cast %18 : vector<16xf32> to vector<16x1xf32>
    %20 = math.log %19 : vector<16x1xf32>
    %21 = arith.addf %14, %20 : vector<16x1xf32>
    %22 = tpu.iota {dimensions = array<i32: 1>} : vector<16x128xi32>
    %c0_7 = arith.constant 0 : index
    %c0_8 = arith.constant 0 : index
    %23 = vector.load %arg2[%c0_7, %c0_8] : memref<16x1xi32, #tpu.memory_space<vmem>>, vector<16x1xi32>
    %24 = vector.broadcast %23 : vector<16x1xi32> to vector<16x128xi32>
    %25 = arith.cmpi eq, %22, %24 : vector<16x128xi32>
    %cst_9 = arith.constant 0.000000e+00 : f32
    %26 = vector.broadcast %cst_9 : f32 to vector<16x128xf32>
    %27 = arith.select %25, %11, %26 : vector<16x128xi1>, vector<16x128xf32>
    %cst_10 = arith.constant dense<0.000000e+00> : vector<16xf32>
    %28 = vector.multi_reduction <add>, %27, %cst_10 [1] : vector<16x128xf32> to vector<16xf32>
    %29 = vector.shape_cast %28 : vector<16xf32> to vector<16x1xf32>
    %c16_i32 = arith.constant 16 : i32
    %30 = arith.muli %arg0, %c16_i32 : i32
    %31 = tpu.iota {dimensions = array<i32: 0>} : vector<16x1xi32>
    %32 = vector.broadcast %30 : i32 to vector<16x1xi32>
    %33 = arith.addi %32, %31 : vector<16x1xi32>
    %c16_i32_11 = arith.constant 16 : i32
    %34 = vector.broadcast %c16_i32_11 : i32 to vector<16x1xi32>
    %35 = arith.cmpi slt, %33, %34 : vector<16x1xi32>
    %36 = arith.subf %21, %29 : vector<16x1xf32>
    %cst_12 = arith.constant 0.000000e+00 : f32
    %37 = vector.broadcast %cst_12 : f32 to vector<16x1xf32>
    %38 = arith.select %35, %36, %37 : vector<16x1xi1>, vector<16x1xf32>
    %c0_13 = arith.constant 0 : index
    %c0_14 = arith.constant 0 : index
    %39 = vector.load %arg5[%c0_13, %c0_14] : memref<16x1xf32, #tpu.memory_space<vmem>>, vector<16x1xf32>
    tpu.vector_store %arg5[%c0_13, %c0_14], %38 {strides = array<i32>} : memref<16x1xf32, #tpu.memory_space<vmem>>, vector<16x1xf32>,
    return
  }
  func.func @transform_0(%arg0: i32) -> (i32, i32) {
    %c0_i32 = arith.constant 0 : i32
    %c0_i32_0 = arith.constant 0 : i32
    return %arg0, %c0_i32 : i32, i32
  }
  func.func @transform_1(%arg0: i32) -> (i32, i32) {
    %c0_i32 = arith.constant 0 : i32
    %c0_i32_0 = arith.constant 0 : i32
    return %arg0, %c0_i32 : i32, i32
  }
  func.func @transform_2(%arg0: i32) -> (i32, i32) {
    %c0_i32 = arith.constant 0 : i32
    %c0_i32_0 = arith.constant 0 : i32
    %c0_i32_1 = arith.constant 0 : i32
    return %c0_i32, %c0_i32_0 : i32, i32
  }
  func.func @transform_3(%arg0: i32) -> (i32, i32) {
    %c0_i32 = arith.constant 0 : i32
    %c0_i32_0 = arith.constant 0 : i32
    return %arg0, %c0_i32 : i32, i32
  }
  func.func @transform_4(%arg0: i32) -> (i32, i32) {
    %c0_i32 = arith.constant 0 : i32
    %c0_i32_0 = arith.constant 0 : i32
    return %arg0, %c0_i32 : i32, i32
  }
}

</mosaic_0001>

<bundles_post_ra>
// kernel: tpu_custom_call.1
= control target key start
LH: loop header
LB: loop body
LE: loop exit
PB: predicated region body
PF: predicated region fallthrough
CT: control target
= control target key end

     0   :  { %10 = vsyncpa [#allocation3], 0  ;;  %s416_s0 = inlined_call_operand.vmem [shape: s32[16,1], index: 0, kind: input, shape index: {}]   ;;  %s417_s1 = inlined_call_operand.vmem [shape: s32[16,1], index: 1, kind: input, shape index: {}]   ;;  %s418_s2 = inlined_call_operand.hbm [shape: f32[72,128], index: 2, kind: input, shape index: {}]   ;;  %s419_s3 = inlined_call_operand.hbm [shape: f32[16,128], index: 3, kind: output, shape index: {0}]   ;;  %s420_s4 = inlined_call_operand.vmem [shape: f32[16,1], index: 4, kind: output, shape index: {1}]  }
   0x1   :  { %11 = vsyncpa [#allocation4], 0  ;;  %s337_s15 = smov [#allocation2]   ;;  %s289_s19 = scalar_lea.hbm %s418_s2, 1152 }
   0x2   :  { %s21_s16 = sshll.u32 %s337_s15, 4  ;;  %p290_p0 = scmp.ne.s32.totalorder %s418_s2, %s289_s19  ;;  %s22_s16 = int_to_ptr.vmem [resolvable:$true] %s21_s16 }
   0x3   :  { %p293_p1 = scmp.lt.u32.totalorder %s289_s19, %s418_s2 }
   0x5   :  { %p295_p2 = pnand %p293_p1, %p290_p0 }
   0x7   :  { %298 = shalt.err (!%p295_p2)
}
   0x8   :  { %s299_s24 = scalar_lea.vmem %s22_s16, 1152  ;;  %p304_p4 = scmp.lt.s32.totalorder %s22_s16, %s22_s16 }
   0x9   :  { %p300_p3 = scmp.ne.s32.totalorder %s22_s16, %s299_s24  ;;  %p305_p5 = scmp.lt.s32.totalorder %s299_s24, %s299_s24 }
   0xb   :  { %p306_p6 = por %p305_p5, %p304_p4 }
   0xd   :  { %p307_p7 = pnand %p306_p6, %p300_p3 }
   0xf   :  { %310 = shalt.err (!%p307_p7)
}
  0x10   :  { %s338_s25 = smov 128   ;;  %s339_s26 = smov 8  }
  0x11   :  { %27 = dma.hbm_to_vmem [thread:$0]  %s418_s2, 1152, %s22_s16, [#allocation3], %s338_s25, %s338_s25, %s339_s26  }
  0x12   :  { %333 = dma.done.wait [#allocation3], 1152  }
  0x13   :  { %334 = vsyncadd [#allocation3], 4294966144  ;;  %v340_v0 = vmov 0   ;;  %v31_v1 = vld [vmem:[%s416_s0] sm:$0xff]  ;;  %v32_v2 = vld [vmem:[%s416_s0 + $0x8] sm:$0xff]  ;;  %v41_v21 = vlaneseq  ;;  %vm64_vm4 = vcmask 588800  }
  0x14   :  { %279 = vset.pattern.permute.xlu0 %v340_v0  ;;  %280 = vset.pattern.permute.xlu1 %v340_v0  ;;  %vm33_vm0 = vcmp.gt.s32.totalorder %v31_v1, 0  ;;  %vm35_vm1 = vcmp.gt.s32.totalorder %v32_v2, 0  ;;  %v55_v3 = vld [vmem:[#allocation2] sm:$0xff]  ;;  %v56_v4 = vld [vmem:[#allocation2 + $0x8] sm:$0xff]  ;;  %v57_v5 = vld [vmem:[#allocation2 + $0x10] sm:$0xff]  ;;  %v341_v24 = vmov 0.0  }
  0x15   :  { %v34_v6 = vsel %vm33_vm0, %v31_v1, 0  ;;  %v36_v7 = vsel %vm35_vm1, %v32_v2, 0  ;;  %v257_v8 = vpack.c.bf16 %v56_v4, %v55_v3  ;;  %v58_v9 = vld [vmem:[#allocation2 + $0x18] sm:$0xff]  ;;  %v59_v11 = vld [vmem:[#allocation2 + $0x20] sm:$0xff]  ;;  %v60_v12 = vld [vmem:[#allocation2 + $0x28] sm:$0xff]  ;;  %v42_v22 = vand.u32 127, %v41_v21 }
  0x16   :  { %vm37_vm2 = vcmp.lt.s32.totalorder %v34_v6, 64  ;;  %vm39_vm3 = vcmp.lt.s32.totalorder %v36_v7, 64  ;;  %v261_v10 = vpack.c.bf16 %v58_v9, %v57_v5  ;;  %v265_v15 = vpack.c.bf16 %v60_v12, %v59_v11  ;;  %v61_v16 = vld [vmem:[#allocation2 + $0x30] sm:$0xff]  ;;  %v62_v17 = vld [vmem:[#allocation2 + $0x38] sm:$0xff]  ;;  %v168_v18 = vld [vmem:[%s417_s1] sm:$0xff] }
  0x17   :  { %v38_v13 = vsel %vm37_vm2, %v34_v6, 64  ;;  %258 = vmatprep.subr.bf16.mxu0 %v257_v8  ;;  %v40_v14 = vsel %vm39_vm3, %v36_v7, 64  ;;  %v269_v19 = vpack.c.bf16 %v62_v17, %v61_v16  ;;  %v63_v20 = vld [vmem:[#allocation2 + $0x40] sm:$0xff]  ;;  %v169_v30 = vld [vmem:[%s417_s1 + $0x8] sm:$0xff]  ;;  %s342_s1 = smov [#allocation5]  }
  0x18   :  { %44 = vperm.xlu0 %279, %v38_v13   ;;  %260 = vmatpush3.bf16.msra.mxu0 %v257_v8  ;;  %s205_s9 = sshll.u32 %s342_s1, 4  ;;  %s206_s9 = int_to_ptr.vmem [resolvable:$true] %s205_s9 }
  0x19   :  { %262 = vmatprep.subr.bf16.mxu0 %v261_v10  ;;  %s311_s10 = scalar_lea.vmem %s206_s9, 256  ;;  %p316_p9 = scmp.lt.s32.totalorder %s206_s9, %s206_s9 }
  0x1a   :  { %p312_p8 = scmp.ne.s32.totalorder %s206_s9, %s311_s10  ;;  %p317_p10 = scmp.lt.s32.totalorder %s311_s10, %s311_s10 }
  0x1c   :  { %47 = vperm.xlu0 %279, %v40_v14   ;;  %264 = vmatpush3.bf16.msra.mxu0 %v261_v10  ;;  %p318_p11 = por %p317_p10, %p316_p9 }
  0x1d   :  { %266 = vmatprep.subr.bf16.mxu0 %v265_v15 }
  0x1e   :  { %p319_p12 = pnand %p318_p11, %p312_p8 }
  0x20   :  { %171 = vperm.xlu0 %279, %v168_v18   ;;  %268 = vmatpush3.bf16.msra.mxu0 %v265_v15 }
  0x21   :  { %270 = vmatprep.subr.bf16.mxu0 %v269_v19 }
  0x24   :  { %272 = vmatpush3.bf16.msra.mxu0 %v269_v19 }
  0x25   :  { %252 = vmatprep.subr.mxu0 %v63_v20 }
  0x28   :  { %253 = vmatpush3.msra.mxu0 %v63_v20 }
  0x97   :  { %v45_v23 = vpop.permute.xlu0 %44 }
  0x98   :  { %vm49_vm5 = vcmp.eq.s32.totalorder %v42_v22, %v45_v23 }
  0x99   :  { %v221_v25 = vsel %vm49_vm5, 1.0, %v341_v24 }
  0x9a   :  { %254 = vmatprep.mubr.msk.f32.mxu0 %vm64_vm4, %v221_v25 }
  0x9b   :  { %v48_v26 = vpop.permute.xlu0 %47 }
  0x9c   :  { %vm50_vm6 = vcmp.eq.s32.totalorder %v42_v22, %v48_v26 }
  0x9d   :  { %v222_v27 = vsel %vm50_vm6, 1.0, %v341_v24 }
  0x9e   :  { %255 = vmatmul.mubr.msk.f32.vlgmr.msra.gmra.mrb[0].mxu0 %vm64_vm4, %v222_v27 }
  0x9f   :  { %v172_v39 = vpop.permute.xlu0 %171 }
  0xa0   :  { %vm176_vm7 = vcmp.eq.s32.totalorder %v42_v22, %v172_v39 }
 0x171   :  { %v256_v28 = vpop.f32.mrb[0].mxu0 }
 0x172   :  { %147 = vst [vmem:[#allocation5 + $0x8] sm:$0xff] %v256_v28  ;;  %150 = vmax.xlane.f32.xlu1 %v256_v28  ;;  %v137_v29 = vpop.f32.mrb[1].mxu0 }
 0x173   :  { %146 = vst [vmem:[#allocation5] sm:$0xff] %v137_v29  ;;  %v178_v41 = vsel %vm176_vm7, %v137_v29, 0.0 }
 0x176   :  { %148 = vmax.xlane.f32.xlu1 %v137_v29 }
 0x187   :  { %174 = vperm.xlu1 %280, %v169_v30  }
 0x1ff   :  { %v151_v31 = vpop.xlane.xlu1 %150 }
 0x200   :  { %v153_v32 = vsub.f32 %v256_v28, %v151_v31 }
 0x202   :  { %v156_v33 = vmul.f32 1.442695, %v153_v32 }
 0x203   :  { %v149_v34 = vpop.xlane.xlu1 %148 }
 0x204   :  { %281 = vpow2.f32 %v156_v33  ;;  %v152_v35 = vsub.f32 %v137_v29, %v149_v34 }
 0x206   :  { %v154_v36 = vmul.f32 1.442695, %v152_v35 }
 0x207   :  { %v175_v40 = vpop.permute.xlu1 %174 }
 0x208   :  { %283 = vpow2.f32 %v154_v36  ;;  %vm177_vm8 = vcmp.eq.s32.totalorder %v42_v22, %v175_v40 }
 0x209   :  { %v179_v42 = vsel %vm177_vm8, %v256_v28, 0.0 }
 0x20e   :  { %v282_v37 = vpop.eup %281 }
 0x20f   :  { %160 = vadd.xlane.f32.xlu1 %v282_v37 }
 0x212   :  { %v284_v38 = vpop.eup %283 }
 0x213   :  { %158 = vadd.xlane.f32.xlu0 %v284_v38 }
 0x217   :  { %180 = vadd.xlane.f32.xlu0 %v178_v41 }
 0x21b   :  { %182 = vadd.xlane.f32.xlu0 %v179_v42 }
 0x21c   :  { %322 = shalt.err (!%p319_p12)
}
 0x21d   :  { %s323_s13 = scalar_lea.hbm %s419_s3, 256 }
 0x21e   :  { %p324_p13 = scmp.ne.s32.totalorder %s419_s3, %s323_s13  ;;  %p327_p0 = scmp.lt.u32.totalorder %s323_s13, %s419_s3 }
 0x220   :  { %p329_p1 = pnand %p327_p0, %p324_p13 }
 0x222   :  { %332 = shalt.err (!%p329_p1)
}
 0x223   :  { %211 = dma.vmem_to_hbm [thread:$0]  %s206_s9, 256, %s419_s3, [#allocation4], %s338_s25, %s338_s25, %s339_s26   ;;  %vm197_vm9 = vcmask 7168  }
 0x29c   :  { %v161_v43 = vpop.xlane.xlu1 %160 }
 0x29d   :  { %285 = vlog2.f32 %v161_v43 }
 0x2a0   :  { %v159_v44 = vpop.xlane.xlu0 %158 }
 0x2a1   :  { %287 = vlog2.f32 %v159_v44 }
 0x2a4   :  { %v181_v45 = vpop.xlane.xlu0 %180 }
 0x2a7   :  { %v286_v46 = vpop.eup %285 }
 0x2a8   :  { %v165_v47 = vmul.f32 0.6931472, %v286_v46  ;;  %v183_v50 = vpop.xlane.xlu0 %182 }
 0x2aa   :  { %v167_v48 = vadd.f32 %v165_v47, %v151_v31 }
 0x2ab   :  { %v288_v49 = vpop.eup %287 }
 0x2ac   :  { %v163_v51 = vmul.f32 0.6931472, %v288_v49  ;;  %v194_v52 = vsub.f32 %v167_v48, %v183_v50 }
 0x2ae   :  { %v166_v53 = vadd.f32 %v163_v51, %v149_v34  ;;  %199 = vst.msk [vmem:[%s420_s4 + $0x8] sm:$0xff] %vm197_vm9, %v194_v52 }
 0x2b0   :  { %v193_v54 = vsub.f32 %v166_v53, %v181_v45 }
 0x2b2   :  { %198 = vst.msk [vmem:[%s420_s4] sm:$0xff] %vm197_vm9, %v193_v54 }
 0x2b3   :  { %335 = dma.done.wait [#allocation4], 256  }
 0x2b4   :  { %336 = vsyncadd [#allocation4], 4294967040 }
 0x2b5   :  { %219 = vsyncpa [#allocation3], 1 }
 0x2b6   :  { %220 = vsyncpa [#allocation4], 1 }

</bundles_post_ra>
